<compile_context>
chip_gen: v6e
topology: v6e:2x2x1
jax: 0.10.0
libtpu: 0.0.40
codegen_flags: <defaults>
</compile_context>

<pallas_src>
import jax
import jax.numpy as jnp
from jax.experimental import pallas as pl
from jax.experimental.pallas import tpu as pltpu


# --------------------------------------------------------------------------- #
# Kernel
# --------------------------------------------------------------------------- #
def adapter_kernel(x_ref, wd_ref, bd_ref, wu_ref, bu_ref, o_ref):
    # x_ref : (tm, Dp)   token tile (bf16)
    # wd_ref: (Dp, Bp)   down-proj weight (pre-transposed, padded), bf16
    # bd_ref: (1, Bp)    down-proj bias (zero padded), bf16
    # wu_ref: (Bp, Dp)   up-proj weight (pre-transposed, padded rows/cols = 0)
    # bu_ref: (1, Dp)    up-proj bias (zero padded), bf16
    # o_ref : (tm, Dp)   output tile (bf16)
    x = x_ref[...]
    h = jnp.dot(x, wd_ref[...], preferred_element_type=jnp.float32)
    h = jnp.maximum(h + bd_ref[...], 0.0)                      # ReLU in f32
    y = jnp.dot(h.astype(wu_ref.dtype), wu_ref[...],
                preferred_element_type=jnp.float32)
    y = y + bu_ref[...] + x.astype(jnp.float32)                # bias + residual
    o_ref[...] = y.astype(o_ref.dtype)


# --------------------------------------------------------------------------- #
# Tiling / VMEM accounting
# --------------------------------------------------------------------------- #
def _round_up(v, k):
    return ((v + k - 1) // k) * k


def _per_row_bytes(d_pad, b_pad, csize):
    # Per-token-row bytes that scale with tm:
    #   x tile (2 buffers) + out tile (2 buffers)   : 2*2*Dp*csize
    #   h (f32) + h cast back to compute dtype      : Bp*4 + Bp*csize
    #   y (f32) + residual upcast of x (f32)        : 2*Dp*4
    return 4 * d_pad * csize + b_pad * (4 + csize) + 8 * d_pad


def _resident_bytes(d_pad, b_pad, csize):
    # Single-buffered (pl.Buffered(1)) weights + biases.
    return 2 * d_pad * b_pad * csize + (b_pad + d_pad) * csize


def _pick_tm(m, d_pad, b_pad, csize, budget_bytes):
    """Largest token tile whose honest pipelined footprint fits the budget."""
    per_row = _per_row_bytes(d_pad, b_pad, csize)
    resident = _resident_bytes(d_pad, b_pad, csize)
    avail = budget_bytes - resident
    if avail < 8 * per_row:
        # Weights (nearly) exceed the budget: keep a sane tile and rely on the
        # explicit vmem_limit_bytes below instead of collapsing to tm=8.
        # TODO(synk): for very large adapters, add a K-accumulation grid axis
        # over d_model/bottleneck instead of holding full weights resident.
        tm = 256
    else:
        tm = avail // per_row
    tm = int(min(tm, 1024))
    if m > 8:
        # Guarantee >= 2 grid steps so the "parallel" token axis can shard
        # across v7x's two TensorCores (harmless on single-TC v5e/v6e).
        tm = min(tm, _round_up(pl.cdiv(m, 2), 8))
    tm = min(tm, m)
    if tm < m:
        tm = max(8, (tm // 8) * 8)   # (8, 128) block-shape constraint
    return tm


def _resident_spec(shape):
    """Constant-index, single-buffered (VMEM-resident) BlockSpec."""
    index_map = lambda i: (0,) * len(shape)
    try:
        return pl.BlockSpec(shape, index_map, pipeline_mode=pl.Buffered(1))
    except Exception:   # older jax without pipeline_mode / Buffered
        return pl.BlockSpec(shape, index_map)


# --------------------------------------------------------------------------- #
# Wrapper
# --------------------------------------------------------------------------- #
def adapter_forward(x, w_down, b_down, w_up, b_up, *, tm=None,
                    compute_dtype=jnp.bfloat16,
                    vmem_budget_bytes=12 * 1024 * 1024):
    """x: (batch, seq, d_model).
    w_down: (d_model, bottleneck) [pre-transposed], b_down: (bottleneck,),
    w_up: (bottleneck, d_model) [pre-transposed],  b_up: (d_model,).
    Returns up_proj(relu(down_proj(x))) + x in x.dtype."""
    batch, seq, d_model = x.shape
    bottleneck = w_down.shape[1]
    m = batch * seq
    out_dtype = x.dtype
    csize = jnp.dtype(compute_dtype).itemsize

    d_pad = _round_up(d_model, 128)
    b_pad = _round_up(bottleneck, 128)

    # bf16 streaming / MXU path (f32 accumulation inside the kernel).
    xc = x.astype(compute_dtype).reshape(m, d_model)
    wd = w_down.astype(compute_dtype)
    bd = b_down.astype(compute_dtype)
    wu = w_up.astype(compute_dtype)
    bu = b_up.astype(compute_dtype)

    # Zero-pad d_model and bottleneck to multiples of 128: padded h columns are
    # ReLU(0 + 0) = 0, padded up-proj rows are 0, and padded output lanes are
    # 0 + 0 + 0 (sliced off), so the result is unchanged.
    if d_pad != d_model:
        xc = jnp.pad(xc, ((0, 0), (0, d_pad - d_model)))
        wd = jnp.pad(wd, ((0, d_pad - d_model), (0, 0)))
        wu = jnp.pad(wu, ((0, 0), (0, d_pad - d_model)))
        bu = jnp.pad(bu, ((0, d_pad - d_model),))
    if b_pad != bottleneck:
        wd = jnp.pad(wd, ((0, 0), (0, b_pad - bottleneck)))
        bd = jnp.pad(bd, ((0, b_pad - bottleneck),))
        wu = jnp.pad(wu, ((0, b_pad - bottleneck), (0, 0)))

    bd = bd.reshape(1, b_pad)
    bu = bu.reshape(1, d_pad)

    if tm is None:
        tm = _pick_tm(m, d_pad, b_pad, csize, vmem_budget_bytes)
    tm = min(int(tm), m)
    if tm < m and tm % 8 != 0:
        tm = max(8, (tm // 8) * 8)
    grid = (pl.cdiv(m, tm),)

    # Explicit VMEM limit from the honest footprint (+ headroom), clamped to a
    # range that is legal on every generation (>= v5e default, <= v7x physical).
    footprint = _resident_bytes(d_pad, b_pad, csize) + tm * _per_row_bytes(
        d_pad, b_pad, csize)
    vmem_limit = int(min(max(footprint + 4 * 1024 * 1024, 16 * 1024 * 1024),
                         32 * 1024 * 1024))

    cost = pl.CostEstimate(
        flops=2 * 2 * m * d_pad * b_pad,
        transcendentals=0,
        bytes_accessed=2 * m * d_pad * csize          # x in + out
        + 2 * d_pad * b_pad * csize                   # the two weights
        + (b_pad + d_pad) * csize,                    # biases
    )

    out2d = pl.pallas_call(
        adapter_kernel,
        out_shape=jax.ShapeDtypeStruct((m, d_pad), compute_dtype),
        grid=grid,
        in_specs=[
            pl.BlockSpec((tm, d_pad), lambda i: (i, 0)),   # x: streams
            _resident_spec((d_pad, b_pad)),                # w_down (resident)
            _resident_spec((1, b_pad)),                    # b_down (resident)
            _resident_spec((b_pad, d_pad)),                # w_up   (resident)
            _resident_spec((1, d_pad)),                    # b_up   (resident)
        ],
        out_specs=pl.BlockSpec((tm, d_pad), lambda i: (i, 0)),
        compiler_params=pltpu.CompilerParams(
            dimension_semantics=("parallel",),
            vmem_limit_bytes=vmem_limit),
        cost_estimate=cost,
    )(xc, wd, bd, wu, bu)

    if d_pad != d_model:
        out2d = out2d[:, :d_model]
    return out2d.reshape(batch, seq, d_model).astype(out_dtype)


# --------------------------------------------------------------------------- #
# References
# --------------------------------------------------------------------------- #
def reference_forward(x, w_down, b_down, w_up, b_up):
    h = jnp.maximum(x @ w_down + b_down, 0.0)
    return h @ w_up + b_up + x


def reference_forward_bf16(x, w_down, b_down, w_up, b_up):
    """Mimics the kernel's numerics (bf16 streaming, f32 accumulation)."""
    bf = jnp.bfloat16
    xb = x.astype(bf)
    h = jnp.dot(xb, w_down.astype(bf), preferred_element_type=jnp.float32)
    h = jnp.maximum(h + b_down.astype(bf), 0.0)
    y = jnp.dot(h.astype(bf), w_up.astype(bf),
                preferred_element_type=jnp.float32)
    y = y + b_up.astype(bf) + xb.astype(jnp.float32)
    return y.astype(bf).astype(x.dtype)


if __name__ == "__main__":
    # Small shapes consistent with the module: d_model=32, bottleneck=64,
    # batch=2, seq=8.
    batch, seq, d_model, bottleneck = 2, 8, 32, 64

    key = jax.random.PRNGKey(0)
    kx, kwd, kbd, kwu, kbu = jax.random.split(key, 5)

    x = jax.random.normal(kx, (batch, seq, d_model), dtype=jnp.float32)

    # Deterministic parameter init (mimics nn.Linear's uniform(-1/sqrt(fan_in), .)),
    # stored pre-transposed as (in_features, out_features).
    lim_d = 1.0 / jnp.sqrt(jnp.float32(d_model))
    lim_u = 1.0 / jnp.sqrt(jnp.float32(bottleneck))
    w_down = jax.random.uniform(kwd, (d_model, bottleneck), jnp.float32, -lim_d, lim_d)
    b_down = jax.random.uniform(kbd, (bottleneck,), jnp.float32, -lim_d, lim_d)
    w_up = jax.random.uniform(kwu, (bottleneck, d_model), jnp.float32, -lim_u, lim_u)
    b_up = jax.random.uniform(kbu, (d_model,), jnp.float32, -lim_u, lim_u)

    # Auto tm -> 8 rows per tile on m=16 tokens -> grid of 2, exercising the
    # tiled / pipelined / two-TensorCore path.
    out = adapter_forward(x, w_down, b_down, w_up, b_up)
    out = jax.block_until_ready(out)
    assert out.shape == (batch, seq, d_model)

    # Strict check against a reference mimicking the kernel's bf16 numerics.
    ref_bf16 = reference_forward_bf16(x, w_down, b_down, w_up, b_up)
    assert jnp.allclose(out, ref_bf16, atol=1e-2, rtol=1e-2)

    # Loose check against the full-f32 reference (bf16 rounding only).
    ref_f32 = reference_forward(x, w_down, b_down, w_up, b_up)
    assert jnp.allclose(out, ref_f32, atol=1e-1, rtol=1e-1)

    print("KERNEL_OK")
</pallas_src>

<mosaic_0001>
module attributes {stable_mosaic.version = 11 : i64} {
  func.func @adapter_kernel(%arg0: i32, %arg1: memref<8x128xbf16, #tpu.memory_space<vmem>>, %arg2: memref<128x128xbf16, #tpu.memory_space<vmem>>, %arg3: memref<1x128xbf16, #tpu.memory_space<vmem>>, %arg4: memref<128x128xbf16, #tpu.memory_space<vmem>>, %arg5: memref<1x128xbf16, #tpu.memory_space<vmem>>, %arg6: memref<8x128xbf16, #tpu.memory_space<vmem>>) attributes {dimension_semantics = [#tpu.dimension_semantics<parallel>], iteration_bounds = array<i64: 2>, scalar_prefetch = 0 : i64, scratch_operands = 0 : i64, tpu.core_type = #tpu.core_type<tc>, window_params = [{transform_indices = @transform_0, window_bounds = array<i64: 8, 128>}, {pipeline_mode = #tpu.pipeline_mode<synchronous>, transform_indices = @transform_1, window_bounds = array<i64: 128, 128>}, {pipeline_mode = #tpu.pipeline_mode<synchronous>, transform_indices = @transform_2, window_bounds = array<i64: 1, 128>}, {pipeline_mode = #tpu.pipeline_mode<synchronous>, transform_indices = @transform_3, window_bounds = array<i64: 128, 128>}, {pipeline_mode = #tpu.pipeline_mode<synchronous>, transform_indices = @transform_4, window_bounds = array<i64: 1, 128>}, {transform_indices = @transform_5, window_bounds = array<i64: 8, 128>}]} {
    %c0 = arith.constant 0 : index
    %c0_0 = arith.constant 0 : index
    %0 = vector.load %arg1[%c0, %c0_0] : memref<8x128xbf16, #tpu.memory_space<vmem>>, vector<8x128xbf16>
    %c0_1 = arith.constant 0 : index
    %c0_2 = arith.constant 0 : index
    %1 = vector.load %arg2[%c0_1, %c0_2] : memref<128x128xbf16, #tpu.memory_space<vmem>>, vector<128x128xbf16>
    %cst = arith.constant dense<0.000000e+00> : vector<8x128xf32>
    %2 = tpu.matmul %0, %1, %cst {dimension_numbers = #tpu.dot_dimension_numbers<[1], [0], [0], [1], [0, 0, 1, 1], [], []>} : vector<8x128xbf16>, vector<128x128xbf16>, vector<8x128xf32> -> vector<8x128xf32>
    %c0_3 = arith.constant 0 : index
    %c0_4 = arith.constant 0 : index
    %3 = vector.load %arg3[%c0_3, %c0_4] : memref<1x128xbf16, #tpu.memory_space<vmem>>, vector<1x128xbf16>
    %4 = arith.extf %3 : vector<1x128xbf16> to vector<1x128xf32>
    %5 = vector.broadcast %4 : vector<1x128xf32> to vector<8x128xf32>
    %6 = arith.addf %2, %5 : vector<8x128xf32>
    %cst_5 = arith.constant 0.000000e+00 : f32
    %7 = vector.broadcast %cst_5 : f32 to vector<8x128xf32>
    %8 = arith.maximumf %6, %7 : vector<8x128xf32>
    %9 = arith.truncf %8 : vector<8x128xf32> to vector<8x128xbf16>
    %c0_6 = arith.constant 0 : index
    %c0_7 = arith.constant 0 : index
    %10 = vector.load %arg4[%c0_6, %c0_7] : memref<128x128xbf16, #tpu.memory_space<vmem>>, vector<128x128xbf16>
    %cst_8 = arith.constant dense<0.000000e+00> : vector<8x128xf32>
    %11 = tpu.matmul %9, %10, %cst_8 {dimension_numbers = #tpu.dot_dimension_numbers<[1], [0], [0], [1], [0, 0, 1, 1], [], []>} : vector<8x128xbf16>, vector<128x128xbf16>, vector<8x128xf32> -> vector<8x128xf32>
    %c0_9 = arith.constant 0 : index
    %c0_10 = arith.constant 0 : index
    %12 = vector.load %arg5[%c0_9, %c0_10] : memref<1x128xbf16, #tpu.memory_space<vmem>>, vector<1x128xbf16>
    %13 = arith.extf %12 : vector<1x128xbf16> to vector<1x128xf32>
    %14 = vector.broadcast %13 : vector<1x128xf32> to vector<8x128xf32>
    %15 = arith.addf %11, %14 : vector<8x128xf32>
    %16 = arith.extf %0 : vector<8x128xbf16> to vector<8x128xf32>
    %17 = arith.addf %15, %16 : vector<8x128xf32>
    %18 = arith.truncf %17 : vector<8x128xf32> to vector<8x128xbf16>
    %c0_11 = arith.constant 0 : index
    %c0_12 = arith.constant 0 : index
    %19 = vector.load %arg6[%c0_11, %c0_12] : memref<8x128xbf16, #tpu.memory_space<vmem>>, vector<8x128xbf16>
    tpu.vector_store %arg6[%c0_11, %c0_12], %18 {strides = array<i32>} : memref<8x128xbf16, #tpu.memory_space<vmem>>, vector<8x128xbf16>,
    return
  }
  func.func @transform_0(%arg0: i32) -> (i32, i32) {
    %c0_i32 = arith.constant 0 : i32
    %c0_i32_0 = arith.constant 0 : i32
    return %arg0, %c0_i32 : i32, i32
  }
  func.func @transform_1(%arg0: i32) -> (i32, i32) {
    %c0_i32 = arith.constant 0 : i32
    %c0_i32_0 = arith.constant 0 : i32
    %c0_i32_1 = arith.constant 0 : i32
    return %c0_i32, %c0_i32_0 : i32, i32
  }
  func.func @transform_2(%arg0: i32) -> (i32, i32) {
    %c0_i32 = arith.constant 0 : i32
    %c0_i32_0 = arith.constant 0 : i32
    %c0_i32_1 = arith.constant 0 : i32
    return %c0_i32, %c0_i32_0 : i32, i32
  }
  func.func @transform_3(%arg0: i32) -> (i32, i32) {
    %c0_i32 = arith.constant 0 : i32
    %c0_i32_0 = arith.constant 0 : i32
    %c0_i32_1 = arith.constant 0 : i32
    return %c0_i32, %c0_i32_0 : i32, i32
  }
  func.func @transform_4(%arg0: i32) -> (i32, i32) {
    %c0_i32 = arith.constant 0 : i32
    %c0_i32_0 = arith.constant 0 : i32
    %c0_i32_1 = arith.constant 0 : i32
    return %c0_i32, %c0_i32_0 : i32, i32
  }
  func.func @transform_5(%arg0: i32) -> (i32, i32) {
    %c0_i32 = arith.constant 0 : i32
    %c0_i32_0 = arith.constant 0 : i32
    return %arg0, %c0_i32 : i32, i32
  }
}

</mosaic_0001>

<bundles_post_ra>
// kernel: tpu_custom_call.1
= control target key start
LH: loop header
LB: loop body
LE: loop exit
PB: predicated region body
PF: predicated region fallthrough
CT: control target
= control target key end

     0   :  { %10 = vsyncpa [#allocation3], 0  ;;  %s1149_s0 = inlined_call_operand.hbm [shape: bf16[16,128], index: 0, kind: input, shape index: {}]   ;;  %s1150_s1 = inlined_call_operand.hbm [shape: bf16[128,128], index: 1, kind: input, shape index: {}]   ;;  %s1151_s2 = inlined_call_operand.vmem [shape: bf16[1,128], index: 2, kind: input, shape index: {}]   ;;  %s1152_s3 = inlined_call_operand.hbm [shape: bf16[128,128], index: 3, kind: input, shape index: {}]   ;;  %s1153_s4 = inlined_call_operand.vmem [shape: bf16[1,128], index: 4, kind: input, shape index: {}]   ;;  %s1154_s5 = inlined_call_operand.hbm [shape: bf16[16,128], index: 5, kind: output, shape index: {}]  }
   0x1   :  { %12 = vsyncpa [#allocation3 + $0x1], 0 }
   0x2   :  { %13 = vsyncpa [#allocation6], 0 }
   0x3   :  { %14 = vsyncpa [#allocation4], 0 }
   0x4   :  { %16 = vsyncpa [#allocation4 + $0x1], 0  ;;  %s965_s18 = smov 0   ;;  %s967_s19 = smov 0  }
   0x5   :  { %s969_s20 = smov 0   ;;  %s971_s21 = smov 0  }
   0x6 LB: > { %s986_s22 = sadd.s32 4294967295, %s925_s21   ;;  %s600_s23 = sadd.s32 4294967294, %s925_s21   ;;  %s925_s21 = sphi %s971_s21, %s1176_s21   ;;  %s921_s20 = sphi %s969_s20, %s1175_s20   ;;  %s917_s19 = sphi %s967_s19, %s1174_s19   ;;  %s913_s18 = sphi %s965_s18, %s1173_s18  }
   0x7   : > { %p42_p0 = scmp.ne.s32.totalorder %s917_s19, %s913_s18  ;;  %p1155_p1 = scmp.eq.s32.totalorder %s986_s22, 0 }
   0x8   : > { %p156_p3 = scmp.eq.s32.totalorder %s600_s23, 1  ;;  %p601_p5 = scmp.ge.s32.totalorder %s925_s21, 1 }
   0x9   : > { %p995_p4 = por %p1155_p1, %p42_p0  ;;  %p163_p7 = scmp.lt.s32.totalorder %s925_s21, 3 }
   0xa   : > { %p1000_p6 = por %p156_p3, %p42_p0  ;;  %s927_s27 = smov [#allocation5]  }
   0xb   : > { %s1159_s24 = scalar_select %p995_p4, 1, 0 }
   0xc   : > { %s1160_s25 = scalar_select %p1000_p6, 1, 0 }
   0xd   : > { %p1005_p8 = pnand %p601_p5, %p163_p7  ;;  %s175_s28 = sshll.u32 %s927_s27, 4  ;;  %s176_s28 = int_to_ptr.vmem [resolvable:$true] %s175_s28 }
   0xe   : > { %s928_s30 = smov [#allocation7]   ;;  %s788_s7 = scalar_lea.vmem %s176_s28, 1024 }
   0xf   : > { %s1161_s26 = scalar_select %p1005_p8, 1, 0 }
  0x10   : > { %p702_p9 = pneg %p1005_p8  ;;  %s191_s6 = sshll.u32 %s928_s30, 4  ;;  %s192_s6 = int_to_ptr.vmem [resolvable:$true] %s191_s6 }
  0x11   : > { %p789_p13 = scmp.ne.s32.totalorder %s176_s28, %s788_s7  ;;  %p796_p5 = scmp.lt.s32.totalorder %s176_s28, %s176_s28 }
  0x12   : > { %p1014_p11 = pnand %p702_p9, %p1155_p1  ;;  %p797_p7 = scmp.lt.s32.totalorder %s788_s7, %s788_s7 }
  0x14   : > { %p779_p12 = pneg %p1014_p11  ;;  %p798_p10 = por %p797_p7, %p796_p5 }
  0x16   : > { %p791_p0 = pnand %p789_p13, %p779_p12 }
  0x18   : > { %p792_p3 = pneg %p791_p0 }
  0x1a   : > { %p799_p9 = pnand %p798_p10, %p792_p3 }
  0x1c   : > { %802 = shalt.err (!%p799_p9)
}
  0x1d   : > { %s929_s8 = smov 64   ;;  %s930_s9 = smov 4  }
  0x1e   : > { %705 = dma.hbm_to_vmem [thread:$0]  (!%p1014_p11), %s1150_s1, 1024, %s176_s28, [#allocation6], %s929_s8, %s929_s8, %s930_s9  }
  0x1f   : > { %s814_s12 = scalar_lea.vmem %s192_s6, 1024  ;;  %p822_p2 = scmp.lt.s32.totalorder %s192_s6, %s192_s6 }
  0x20   : > { %p815_p1 = scmp.ne.s32.totalorder %s192_s6, %s814_s12  ;;  %p823_p6 = scmp.lt.s32.totalorder %s814_s12, %s814_s12 }
  0x22   : > { %p817_p13 = pnand %p815_p1, %p779_p12  ;;  %p824_p5 = por %p823_p6, %p822_p2 }
  0x24   : > { %p818_p0 = pneg %p817_p13 }
  0x26   : > { %p825_p10 = pnand %p824_p5, %p818_p0 }
  0x28   : > { %828 = shalt.err (!%p825_p10)
}
  0x29   : > { %708 = dma.hbm_to_vmem [thread:$0]  (!%p1014_p11), %s1152_s3, 1024, %s192_s6, [#allocation6], %s929_s8, %s929_s8, %s930_s9  }
  0x2a   : > { %s1037_s15 = sadd.s32 1, %s925_s21   ;;  %s29_s16 = sadd.s32 1, %s921_s20 }
  0x2b   : > { %s26_s17 = ssub.s32 %s925_s21, %s1037_s15  ;;  %p36_p1 = scmp.ne.s32.totalorder %s921_s20, %s917_s19 }
  0x2c   : > { %p27_p2 = scmp.eq.s32.totalorder %s26_s17, 0  ;;  %p37_p6 = scmp.eq.s32.totalorder %s925_s21, 0 }
  0x2d   : > { %p1163_p12 = scmp.eq.s32.totalorder %s986_s22, 1  ;;  %p719_p7 = scmp.lt.s32.totalorder %s925_s21, 2 }
  0x2e   : > { %s1053_s27 = scalar_select %p27_p2, %s921_s20, %s29_s16  }
  0x2f   : > { %p1047_p3 = por %p1163_p12, %p36_p1  ;;  %p38_p9 = por %p37_p6, %p36_p1 }
  0x30   : > { %s208_s28 = sand.u32 1, %s921_s20   ;;  %s606_s30 = sshll.u32 %s925_s21, 6 }
  0x31   : > { %s1164_s23 = scalar_select %p1047_p3, 1, 0 }
  0x32   : > { %s605_s29 = sshll.u32 %s208_s28, 2  ;;  %s1060_s8 = scalar_lea.hbm %s1149_s0, %s606_s30 }
  0x33   : > { %s212_s9 = scalar_lea.vmem [#allocation2], %s605_s29  ;;  %p1062_p11 = pnand %p719_p7, %p38_p9 }
  0x34   : > { %s219_s10 = sshll.u32 %s212_s9, 4  ;;  %s209_s12 = scalar_lea.sflag [#allocation3], %s208_s28  ;;  %s220_s10 = int_to_ptr.vmem [resolvable:$true] %s219_s10 }
  0x35   : > { %s829_s13 = scalar_lea.hbm %s1060_s8, 64  ;;  %p831_p0 = pneg %p1062_p11 }
  0x36   : > { %p830_p13 = scmp.ne.s32.totalorder %s1060_s8, %s829_s13  ;;  %s834_s17 = scalar_lea.hbm %s1149_s0, 128 }
  0x37   : > { %p835_p1 = scmp.lt.s32.totalorder %s1060_s8, %s1149_s0  ;;  %p836_p2 = scmp.lt.s32.totalorder %s834_s17, %s829_s13 }
  0x38   : > { %p832_p5 = pnand %p831_p0, %p830_p13 }
  0x39   : > { %p837_p6 = por %p836_p2, %p835_p1 }
  0x3a   : > { %p833_p10 = pneg %p832_p5 }
  0x3c   : > { %p838_p12 = pnand %p837_p6, %p833_p10 }
  0x3e   : > { %841 = shalt.err (!%p838_p12)
}
  0x3f   : > { %s842_s6 = scalar_lea.vmem %s220_s10, 64  ;;  %s931_s28 = smov [#allocation2]  }
  0x40   : > { %p843_p7 = scmp.ne.s32.totalorder %s220_s10, %s842_s6  ;;  %s847_s7 = sshll.u32 %s931_s28, 4  ;;  %s848_s7 = int_to_ptr.vmem [resolvable:$false] %s847_s7 }
  0x41   : > { %s849_s9 = scalar_lea.vmem %s848_s7, 128  ;;  %p850_p13 = scmp.lt.s32.totalorder %s220_s10, %s848_s7 }
  0x42   : > { %p845_p9 = pnand %p843_p7, %p831_p0  ;;  %p851_p5 = scmp.lt.s32.totalorder %s849_s9, %s842_s6 }
  0x44   : > { %p846_p3 = pneg %p845_p9  ;;  %p852_p4 = por %p851_p5, %p850_p13 }
  0x46   : > { %p853_p8 = pnand %p852_p4, %p846_p3 }
  0x48   : > { %856 = shalt.err (!%p853_p8)
}
  0x49   : > { %712 = dma.hbm_to_vmem [thread:$0]  (!%p1062_p11), %s1060_s8, 64, %s220_s10, %s209_s12  }
  0x4a   : > { %p1166_p10 = scmp.ne.s32.totalorder %s1161_s26, 0 }
  0x4b   : > { %s1083_s13 = sand.u32 (!%p1166_p10), 1, %s917_s19   ;;  %p1167_p4 = scmp.ne.s32.totalorder (!%p1166_p10), %s1159_s24, 0 }
  0x4c   : > { %228 = sbr.rel (%p1166_p10) target bundleno = 530 (0x212), region = 40  ;;  %s608_s14 = sshll.u32 (!%p1166_p10), %s1083_s13, 2 }
  0x4d   : > { %s231_s16 = scalar_lea.sflag (!%p1166_p10), [#allocation3], %s1083_s13  ;;  %s1089_s17 = scalar_lea.vmem (!%p1166_p10), [#allocation2], %s608_s14 }
  0x51   : > { %900 = dma.done.wait (%p1167_p4), %s231_s16, 64  }
  0x52   : > { %902 = vsyncadd (%p1167_p4), %s231_s16, 4294967232  ;;  %p1168_p8 = scmp.eq.s32.totalorder %s986_s22, 0 }
  0x54   : > { %904 = dma.done.wait (%p1168_p8), [#allocation6], 2048   ;;  %p1169_p3 = pmov %p1168_p8 }
  0x55   : > { %v932_v0 = vmov 0.0   ;;  %vm933_vm0 = vmmov 0   ;;  %v761_v1 = vld [vmem:[#allocation5 + $0x38] sm:$0xff]   ;;  %v762_v2 = vld [vmem:[#allocation5 + $0x30] sm:$0xff]   ;;  %v763_v3 = vld [vmem:[#allocation5 + $0x28] sm:$0xff]   ;;  %v289_v18 = vlaneseq  ;;  %s629_s11 = sshll.u32 %s986_s22, 6 }
  0x56   : > { %906 = vsyncadd (%p1169_p3), [#allocation6], 4294965248  ;;  %650 = vmatprep.subr.bf16.mxu0 %v932_v0  ;;  %666 = vmatprep.mubr.msk.bf16.mxu0 %vm933_vm0, %v932_v0  ;;  %v769_v4 = vld [vmem:[#allocation7 + $0x38] sm:$0xff]   ;;  %v764_v5 = vld [vmem:[#allocation5 + $0x20] sm:$0xff]   ;;  %s268_s12 = scalar_lea.vmem [#allocation8], %s608_s14  ;;  %s1112_s28 = scalar_lea.hbm %s1154_s5, %s629_s11 }
  0x57   : > { %670 = vmatprep.subr.bf16.mxu1 %v932_v0  ;;  %686 = vmatprep.mubr.msk.bf16.mxu1 %vm933_vm0, %v932_v0  ;;  %v770_v6 = vld [vmem:[#allocation7 + $0x30] sm:$0xff]   ;;  %v765_v7 = vld [vmem:[#allocation5 + $0x18] sm:$0xff]   ;;  %v771_v8 = vld [vmem:[#allocation7 + $0x28] sm:$0xff]   ;;  %v290_v19 = vshrl.u32 %v289_v18, 7  ;;  %s511_s30 = sshll.u32 %s268_s12, 4  ;;  %s498_s7 = scalar_lea.sflag [#allocation4], %s1083_s13  ;;  %s512_s30 = int_to_ptr.vmem [resolvable:$true] %s511_s30 }
  0x58   : > { %651 = vmatpush3.bf16.msra.mxu0 %v761_v1  ;;  %671 = vmatpush3.bf16.msra.mxu1 %v769_v4  ;;  %v766_v9 = vld [vmem:[#allocation5 + $0x10] sm:$0xff]   ;;  %v772_v10 = vld [vmem:[#allocation7 + $0x20] sm:$0xff]   ;;  %v767_v11 = vld [vmem:[#allocation5 + $0x8] sm:$0xff]   ;;  %s857_s9 = scalar_lea.vmem %s512_s30, 64  ;;  %p1170_p0 = scmp.ne.s32.totalorder %s1164_s23, 0 }
  0x59   : > { %652 = vmatprep.subr.bf16.mxu0 %v932_v0  ;;  %672 = vmatprep.subr.bf16.mxu1 %v932_v0  ;;  %v773_v12 = vld [vmem:[#allocation7 + $0x18] sm:$0xff]   ;;  %v768_v13 = vld [vmem:[#allocation5] sm:$0xff]   ;;  %v774_v14 = vld [vmem:[#allocation7 + $0x10] sm:$0xff]   ;;  %v291_v22 = vsub.s32 0, %v290_v19  ;;  %p858_p11 = scmp.ne.s32.totalorder %s512_s30, %s857_s9  ;;  %s934_s22 = smov [#allocation8]  }
  0x5a   : > { %v270_v15 = vld [vmem:[%s1089_s17] sm:$0xf]  ;;  %v775_v16 = vld [vmem:[#allocation7 + $0x8] sm:$0xff]   ;;  %v776_v17 = vld [vmem:[#allocation7] sm:$0xff]   ;;  %s861_s14 = sshll.u32 %s934_s22, 4  ;;  %s862_s14 = int_to_ptr.vmem [resolvable:$false] %s861_s14 }
  0x5b   : > { %v287_v20 = vld [vmem:[%s1151_s2] sm:$0x1]  ;;  %v493_v34 = vunpack.c.l.bf16 %v270_v15  ;;  %p859_p1 = pnand %p858_p11, %p1170_p0  ;;  %s863_s16 = scalar_lea.vmem %s862_s14, 128 }
  0x5c   : > { %653 = vmatpush3.bf16.msra.mxu0 %v762_v2  ;;  %673 = vmatpush3.bf16.msra.mxu1 %v770_v6  ;;  %v288_v21 = vunpack.c.l.bf16 %v287_v20  ;;  %v399_v31 = vld [vmem:[%s1153_s4] sm:$0x1]  ;;  %p864_p6 = scmp.lt.s32.totalorder %s512_s30, %s862_s14  ;;  %p865_p12 = scmp.lt.s32.totalorder %s863_s16, %s857_s9 }
  0x5d   : > { %654 = vmatprep.subr.bf16.mxu0 %v932_v0  ;;  %674 = vmatprep.subr.bf16.mxu1 %v932_v0  ;;  %v400_v32 = vunpack.c.l.bf16 %v399_v31  ;;  %p860_p2 = pneg %p859_p1 }
  0x5e   : > { %v292_v23 = vrot.slane %v288_v21, %v291_v22  ;;  %p866_p7 = por %p865_p12, %p864_p6 }
  0x5f   : > { %v404_v33 = vrot.slane %v400_v32, %v291_v22 }
  0x60   : > { %655 = vmatpush3.bf16.msra.mxu0 %v763_v3  ;;  %675 = vmatpush3.bf16.msra.mxu1 %v771_v8  ;;  %p867_p9 = pnand %p866_p7, %p860_p2 }
  0x61   : > { %656 = vmatprep.subr.bf16.mxu0 %v932_v0  ;;  %676 = vmatprep.subr.bf16.mxu1 %v932_v0 }
  0x64   : > { %657 = vmatpush3.bf16.msra.mxu0 %v764_v5  ;;  %677 = vmatpush3.bf16.msra.mxu1 %v772_v10 }
  0x65   : > { %658 = vmatprep.subr.bf16.mxu0 %v932_v0  ;;  %678 = vmatprep.subr.bf16.mxu1 %v932_v0 }
  0x68   : > { %659 = vmatpush3.bf16.msra.mxu0 %v765_v7  ;;  %679 = vmatpush3.bf16.msra.mxu1 %v773_v12 }
  0x69   : > { %660 = vmatprep.subr.bf16.mxu0 %v932_v0  ;;  %680 = vmatprep.subr.bf16.mxu1 %v932_v0 }
  0x6c   : > { %661 = vmatpush3.bf16.msra.mxu0 %v766_v9  ;;  %681 = vmatpush3.bf16.msra.mxu1 %v774_v14 }
  0x6d   : > { %662 = vmatprep.subr.bf16.mxu0 %v932_v0  ;;  %682 = vmatprep.subr.bf16.mxu1 %v932_v0 }
  0x70   : > { %663 = vmatpush3.bf16.msra.mxu0 %v767_v11  ;;  %683 = vmatpush3.bf16.msra.mxu1 %v775_v16 }
  0x71   : > { %664 = vmatprep.subr.bf16.mxu0 %v932_v0  ;;  %684 = vmatprep.subr.bf16.mxu1 %v932_v0 }
  0x74   : > { %665 = vmatpush3.bf16.msra.mxu0 %v768_v13  ;;  %685 = vmatpush3.bf16.msra.mxu1 %v776_v17 }
  0x77   : > { %667 = vmatmul.mubr.bf16.vlgmr.msra.gmra.mxu0 %v270_v15 }
 0x137   : > { %v375_v24 = vpop.f32.mrf.mxu0 }
 0x138   : > { %v376_v25 = vadd.f32 %v375_v24, %v292_v23 }
 0x139   : > { %v668_v26 = vpop.f32.mrf.mxu0 }
 0x13a   : > { %v381_v27 = vmax.f32 %v376_v25, 0.0 }
 0x13b   : > { %v378_v28 = vpop.f32.mrf.mxu0 }
 0x13c   : > { %v382_v29 = vpack.c.bf16 %v381_v27, %v381_v27 }
 0x13d   : > { %v669_v30 = vpop.f32.mrf.mxu0 }
 0x13e   : > { %687 = vmatmul.mubr.bf16.vlgmr.msra.gmra.mxu1 %v382_v29 }
 0x1fe   : > { %v487_v35 = vpop.f32.mrf.mxu1 }
 0x1ff   : > { %v488_v36 = vadd.f32 %v487_v35, %v404_v33 }
 0x200   : > { %v688_v37 = vpop.f32.mrf.mxu1 }
 0x201   : > { %v494_v38 = vadd.f32 %v493_v34, %v488_v36 }
 0x202   : > { %v490_v39 = vpop.f32.mrf.mxu1 }
 0x203   : > { %v495_v40 = vpack.c.bf16 %v494_v38, %v494_v38 }
 0x204   : > { %v689_v41 = vpop.f32.mrf.mxu1 }
 0x205   : > { %496 = vst [vmem:[%s268_s12] sm:$0xf] %v495_v40 }
 0x206   : > { %870 = shalt.err (!%p867_p9)
}
 0x207   : > { %s871_s17 = scalar_lea.hbm %s1112_s28, 64  ;;  %s875_s26 = scalar_lea.hbm %s1154_s5, 128 }
 0x208   : > { %p872_p13 = scmp.ne.s32.totalorder %s1112_s28, %s871_s17  ;;  %p876_p4 = scmp.lt.s32.totalorder %s1112_s28, %s1154_s5 }
 0x209   : > { %p877_p8 = scmp.lt.s32.totalorder %s875_s26, %s871_s17 }
 0x20a   : > { %p873_p5 = pnand %p872_p13, %p1170_p0 }
 0x20b   : > { %p878_p3 = por %p877_p8, %p876_p4 }
 0x20c   : > { %p874_p10 = pneg %p873_p5 }
 0x20e   : > { %p879_p11 = pnand %p878_p3, %p874_p10 }
 0x210   : > { %882 = shalt.err (!%p879_p11)
}
 0x211   : > { %700 = dma.vmem_to_hbm [thread:$0]  (%p1170_p0), %s512_s30, 64, %s1112_s28, %s498_s7  }
 0x212 PF: > { %s523_s11 = sand.u32 1, %s913_s18   ;;  %p1171_p1 = scmp.ne.s32.totalorder %s1160_s25, 0 }
 0x213   : > { %p1172_p2 = scmp.ge.s32.totalorder %s925_s21, 2  ;;  %s524_s12 = scalar_lea.sflag [#allocation4], %s523_s11 }
 0x215   : > { %p714_p6 = pnand %p1172_p2, %p1171_p1 }
 0x217   : > { %p715_p12 = pneg %p714_p6 }
 0x219   : > { %908 = dma.done.wait (%p715_p12), %s524_s12, 64  }
 0x21a   : > { %910 = vsyncadd (%p715_p12), %s524_s12, 4294967232  ;;  %p19_p7 = scmp.ge.s32.totalorder %s1037_s15, 4   ;;  %s1173_s18 = smov %s917_s19 }
 0x21b   : > { %s1174_s19 = smov %s921_s20  ;;  %s1175_s20 = smov %s1053_s27 }
 0x21c   : > { %s1176_s21 = smov %s1037_s15  ;;  %21 = sbr.rel (!%p19_p7) target bundleno = 6 (0x6), region = 93 }
 0x221   :  { %529 = vsyncpa [#allocation3], 1 }
 0x222   :  { %531 = vsyncpa [#allocation3 + $0x1], 1 }
 0x223   :  { %532 = vsyncpa [#allocation6], 1 }
 0x224   :  { %533 = vsyncpa [#allocation4], 1 }
 0x225   :  { %535 = vsyncpa [#allocation4 + $0x1], 1 }

</bundles_post_ra>
